<compile_context>
chip_gen: v5e
topology: v5e:2x2
jax: 0.10.0
libtpu: 0.0.40
codegen_flags: <defaults>
</compile_context>

<pallas_src>
import jax
import jax.numpy as jnp
from jax import lax
from jax.experimental import pallas as pl
from jax.experimental.pallas import tpu as pltpu


def conv1d_relu_kernel(x_ref, w_ref, b_ref, out_ref):
    """One batch block.

    x_ref:  (Bblk, T + K - 1, C_in)  halo-padded activations, bf16, channels on lanes
    w_ref:  (K, C_in, C_out)         tap-major, pre-transposed Conv1d weight, bf16
    b_ref:  (1, C_out)               bias row, f32
    out_ref:(Bblk, T, C_out)         f32
    """
    Bblk, T, C_out = out_ref.shape
    K = w_ref.shape[0]
    C_in = w_ref.shape[1]
    pad = (K - 1) // 2

    # Center tap initializes the accumulator with the bias folded in.
    x_c = x_ref[:, pad:pad + T, :].reshape(Bblk * T, C_in)
    acc = jnp.dot(x_c, w_ref[pad], preferred_element_type=jnp.float32) + b_ref[...]

    # Remaining taps: static (unrolled) loop, one full-rows MXU matmul each.  The halo padding
    # makes every tap a plain sublane slice -- no roll, no mask, no where.
    for k in range(K):
        if k == pad:
            continue
        x_k = x_ref[:, k:k + T, :].reshape(Bblk * T, C_in)
        acc = acc + jnp.dot(x_k, w_ref[k], preferred_element_type=jnp.float32)

    out_ref[...] = jnp.maximum(acc, 0.0).reshape(Bblk, T, C_out)


def _pick_batch_block(B, T):
    """Largest divisor of B keeping Bblk*T around <=512 rows; prefer >=2 grid steps (v7x
    megacore) when each step would still get >=128 rows."""
    divisors = [d for d in range(1, B + 1) if B % d == 0]
    best = 1
    for d in divisors:
        if d * T <= 512:
            best = d
    if B // best < 2:
        for d in reversed(divisors):
            if d < best and d * T >= 128:
                best = d
                break
    return best


def make_conv_layer(weight, bias):
    """Builds the ConvLayer forward.  Weight prep happens once, outside the per-call jit."""
    C_out, C_in, K = weight.shape
    assert K % 2 == 1, "ConvLayer uses symmetric 'same' padding; kernel assumes odd kernel_size"
    pad = (K - 1) // 2

    w_taps = jnp.transpose(weight, (2, 1, 0)).astype(jnp.bfloat16)   # (K, C_in, C_out)
    b_row = bias.astype(jnp.float32)[None, :]                        # (1, C_out)

    @jax.jit
    def forward(x):
        # x: (B, window_size, n_features) -- same layout the PyTorch module takes/returns.
        B, T, _ = x.shape
        bblk = _pick_batch_block(B, T)
        xp = jnp.pad(x, ((0, 0), (pad, pad), (0, 0))).astype(jnp.bfloat16)   # halo pad, bf16
        Tp = T + 2 * pad

        return pl.pallas_call(
            conv1d_relu_kernel,
            out_shape=jax.ShapeDtypeStruct((B, T, C_out), jnp.float32),
            grid=(B // bblk,),
            in_specs=[
                pl.BlockSpec((bblk, Tp, C_in), lambda i: (i, 0, 0)),      # per-step batch block
                pl.BlockSpec((K, C_in, C_out), lambda i: (0, 0, 0)),      # resident weights
                pl.BlockSpec((1, C_out), lambda i: (0, 0)),               # resident bias
            ],
            out_specs=pl.BlockSpec((bblk, T, C_out), lambda i: (i, 0, 0)),
            compiler_params=pltpu.CompilerParams(dimension_semantics=("parallel",)),
        )(xp, w_taps, b_row)

    return forward


def ref_forward(x, weight, bias):
    """Pure-JAX replica of the PyTorch ConvLayer forward (permute/pad/conv/relu/permute)."""
    K = weight.shape[2]
    pad = (K - 1) // 2
    xc = jnp.transpose(x, (0, 2, 1))                                  # (B, C, T)
    xp = jnp.pad(xc, ((0, 0), (0, 0), (pad, pad)))                    # ConstantPad1d(pad, 0.0)
    y = lax.conv_general_dilated(xp, weight, window_strides=(1,), padding="VALID",
                                 dimension_numbers=("NCH", "OIH", "NCH"))
    y = jnp.maximum(y + bias[None, :, None], 0.0)
    return jnp.transpose(y, (0, 2, 1))                                # (B, T, C)


if __name__ == "__main__":
    # Small shapes consistent with ConvLayer(n_features, kernel_size=3) on (batch, window, features).
    B, window_size, n_features, kernel_size = 2, 16, 32, 3

    key = jax.random.PRNGKey(0)
    kx, kw, kb = jax.random.split(key, 3)
    fan_in = n_features * kernel_size
    scale = 1.0 / float(fan_in) ** 0.5           # PyTorch Conv1d init: U(-1/sqrt(C_in*K), +...)
    weight = jax.random.uniform(kw, (n_features, n_features, kernel_size), jnp.float32, -scale, scale)
    bias = jax.random.uniform(kb, (n_features,), jnp.float32, -scale, scale)
    x = jax.random.normal(kx, (B, window_size, n_features), jnp.float32)

    forward = make_conv_layer(weight, bias)
    out = forward(x)
    jax.block_until_ready(out)
    assert out.shape == (B, window_size, n_features), out.shape

    # Tight check: f32 reference on bf16-rounded operands (matches the MXU's bf16 x bf16 -> f32 math).
    x_r = x.astype(jnp.bfloat16).astype(jnp.float32)
    w_r = weight.astype(jnp.bfloat16).astype(jnp.float32)
    ref_tight = ref_forward(x_r, w_r, bias)
    err_tight = float(jnp.max(jnp.abs(out - ref_tight)))
    assert jnp.allclose(out, ref_tight, atol=2e-3, rtol=2e-3), err_tight

    # Loose check: the pure-f32 module reference (bf16 operand rounding accounts for the gap).
    ref_f32 = ref_forward(x, weight, bias)
    err_f32 = float(jnp.max(jnp.abs(out - ref_f32)))
    assert jnp.allclose(out, ref_f32, atol=2e-2, rtol=2e-2), err_f32

    print("KERNEL_OK")
</pallas_src>

<mosaic_0001>
module attributes {stable_mosaic.version = 11 : i64} {
  func.func @conv1d_relu_kernel(%arg0: i32, %arg1: memref<2x18x32xbf16, #tpu.memory_space<vmem>>, %arg2: memref<3x32x32xbf16, #tpu.memory_space<vmem>>, %arg3: memref<1x32xf32, #tpu.memory_space<vmem>>, %arg4: memref<2x16x32xf32, #tpu.memory_space<vmem>>) attributes {dimension_semantics = [#tpu.dimension_semantics<parallel>], iteration_bounds = array<i64: 1>, scalar_prefetch = 0 : i64, scratch_operands = 0 : i64, tpu.core_type = #tpu.core_type<tc>, window_params = [{transform_indices = @transform_0, window_bounds = array<i64: 2, 18, 32>}, {pipeline_mode = #tpu.pipeline_mode<synchronous>, transform_indices = @transform_1, window_bounds = array<i64: 3, 32, 32>}, {pipeline_mode = #tpu.pipeline_mode<synchronous>, transform_indices = @transform_2, window_bounds = array<i64: 1, 32>}, {transform_indices = @transform_3, window_bounds = array<i64: 2, 16, 32>}]} {
    %c0 = arith.constant 0 : index
    %c1 = arith.constant 1 : index
    %c0_0 = arith.constant 0 : index
    %0 = vector.load %arg1[%c0, %c1, %c0_0] : memref<2x18x32xbf16, #tpu.memory_space<vmem>>, vector<2x16x32xbf16>
    %1 = vector.shape_cast %0 : vector<2x16x32xbf16> to vector<32x32xbf16>
    %c1_1 = arith.constant 1 : index
    %c0_2 = arith.constant 0 : index
    %c0_3 = arith.constant 0 : index
    %2 = vector.load %arg2[%c1_1, %c0_2, %c0_3] : memref<3x32x32xbf16, #tpu.memory_space<vmem>>, vector<1x32x32xbf16>
    %3 = vector.shape_cast %2 : vector<1x32x32xbf16> to vector<32x32xbf16>
    %cst = arith.constant dense<0.000000e+00> : vector<32x32xf32>
    %4 = tpu.matmul %1, %3, %cst {dimension_numbers = #tpu.dot_dimension_numbers<[1], [0], [0], [1], [0, 0, 1, 1], [], []>} : vector<32x32xbf16>, vector<32x32xbf16>, vector<32x32xf32> -> vector<32x32xf32>
    %c0_4 = arith.constant 0 : index
    %c0_5 = arith.constant 0 : index
    %5 = vector.load %arg3[%c0_4, %c0_5] : memref<1x32xf32, #tpu.memory_space<vmem>>, vector<1x32xf32>
    %6 = vector.broadcast %5 : vector<1x32xf32> to vector<32x32xf32>
    %7 = arith.addf %4, %6 : vector<32x32xf32>
    %c0_6 = arith.constant 0 : index
    %c0_7 = arith.constant 0 : index
    %c0_8 = arith.constant 0 : index
    %8 = vector.load %arg1[%c0_6, %c0_7, %c0_8] : memref<2x18x32xbf16, #tpu.memory_space<vmem>>, vector<2x16x32xbf16>
    %9 = vector.shape_cast %8 : vector<2x16x32xbf16> to vector<32x32xbf16>
    %c0_9 = arith.constant 0 : index
    %c0_10 = arith.constant 0 : index
    %c0_11 = arith.constant 0 : index
    %10 = vector.load %arg2[%c0_9, %c0_10, %c0_11] : memref<3x32x32xbf16, #tpu.memory_space<vmem>>, vector<1x32x32xbf16>
    %11 = vector.shape_cast %10 : vector<1x32x32xbf16> to vector<32x32xbf16>
    %cst_12 = arith.constant dense<0.000000e+00> : vector<32x32xf32>
    %12 = tpu.matmul %9, %11, %cst_12 {dimension_numbers = #tpu.dot_dimension_numbers<[1], [0], [0], [1], [0, 0, 1, 1], [], []>} : vector<32x32xbf16>, vector<32x32xbf16>, vector<32x32xf32> -> vector<32x32xf32>
    %13 = arith.addf %7, %12 : vector<32x32xf32>
    %c0_13 = arith.constant 0 : index
    %c2 = arith.constant 2 : index
    %c0_14 = arith.constant 0 : index
    %14 = vector.load %arg1[%c0_13, %c2, %c0_14] : memref<2x18x32xbf16, #tpu.memory_space<vmem>>, vector<2x16x32xbf16>
    %15 = vector.shape_cast %14 : vector<2x16x32xbf16> to vector<32x32xbf16>
    %c2_15 = arith.constant 2 : index
    %c0_16 = arith.constant 0 : index
    %c0_17 = arith.constant 0 : index
    %16 = vector.load %arg2[%c2_15, %c0_16, %c0_17] : memref<3x32x32xbf16, #tpu.memory_space<vmem>>, vector<1x32x32xbf16>
    %17 = vector.shape_cast %16 : vector<1x32x32xbf16> to vector<32x32xbf16>
    %cst_18 = arith.constant dense<0.000000e+00> : vector<32x32xf32>
    %18 = tpu.matmul %15, %17, %cst_18 {dimension_numbers = #tpu.dot_dimension_numbers<[1], [0], [0], [1], [0, 0, 1, 1], [], []>} : vector<32x32xbf16>, vector<32x32xbf16>, vector<32x32xf32> -> vector<32x32xf32>
    %19 = arith.addf %13, %18 : vector<32x32xf32>
    %cst_19 = arith.constant 0.000000e+00 : f32
    %20 = vector.broadcast %cst_19 : f32 to vector<32x32xf32>
    %21 = arith.maximumf %19, %20 : vector<32x32xf32>
    %22 = vector.shape_cast %21 : vector<32x32xf32> to vector<2x16x32xf32>
    %c0_20 = arith.constant 0 : index
    %c0_21 = arith.constant 0 : index
    %c0_22 = arith.constant 0 : index
    %23 = vector.load %arg4[%c0_20, %c0_21, %c0_22] : memref<2x16x32xf32, #tpu.memory_space<vmem>>, vector<2x16x32xf32>
    tpu.vector_store %arg4[%c0_20, %c0_21, %c0_22], %22 {strides = array<i32>} : memref<2x16x32xf32, #tpu.memory_space<vmem>>, vector<2x16x32xf32>,
    return
  }
  func.func @transform_0(%arg0: i32) -> (i32, i32, i32) {
    %c0_i32 = arith.constant 0 : i32
    %c0_i32_0 = arith.constant 0 : i32
    %c0_i32_1 = arith.constant 0 : i32
    return %arg0, %c0_i32, %c0_i32_0 : i32, i32, i32
  }
  func.func @transform_1(%arg0: i32) -> (i32, i32, i32) {
    %c0_i32 = arith.constant 0 : i32
    %c0_i32_0 = arith.constant 0 : i32
    %c0_i32_1 = arith.constant 0 : i32
    %c0_i32_2 = arith.constant 0 : i32
    return %c0_i32, %c0_i32_0, %c0_i32_1 : i32, i32, i32
  }
  func.func @transform_2(%arg0: i32) -> (i32, i32) {
    %c0_i32 = arith.constant 0 : i32
    %c0_i32_0 = arith.constant 0 : i32
    %c0_i32_1 = arith.constant 0 : i32
    return %c0_i32, %c0_i32_0 : i32, i32
  }
  func.func @transform_3(%arg0: i32) -> (i32, i32, i32) {
    %c0_i32 = arith.constant 0 : i32
    %c0_i32_0 = arith.constant 0 : i32
    %c0_i32_1 = arith.constant 0 : i32
    return %arg0, %c0_i32, %c0_i32_0 : i32, i32, i32
  }
}

</mosaic_0001>

<bundles_post_ra>
// kernel: forward.1
= control target key start
LH: loop header
LB: loop body
LE: loop exit
PB: predicated region body
PF: predicated region fallthrough
CT: control target
= control target key end

     0   :  { %vm193_vm0 = vcmask 1042432   ;;  %vm194_vm1 = vcmask 1046532   ;;  %vm100_vm2 = vcmask 261120   ;;  %vm22_vm3 = vsmask.f32 3328  ;;  %s489_s0 = inlined_call_operand.vmem [shape: bf16[2,18,32], index: 0, kind: input, shape index: {}]   ;;  %s490_s1 = inlined_call_operand.vmem [shape: bf16[3,32,32], index: 1, kind: input, shape index: {}]   ;;  %s491_s2 = inlined_call_operand.vmem [shape: f32[1,32], index: 2, kind: input, shape index: {}]   ;;  %s492_s3 = inlined_call_operand.hbm [shape: f32[2,16,32], index: 3, kind: output, shape index: {}]  }
   0x1   :  { %v341_v0 = vld [vmem:[%s490_s1 + $0x8] sm:$0xff]  ;;  %v337_v2 = vld [vmem:[%s490_s1 + $0x18] sm:$0xff]  ;;  %v340_v3 = vld [vmem:[%s490_s1] sm:$0xff]  ;;  %vm23_vm5 = vsmask.f32 7440 }
   0x2   :  { %v343_v1 = vld [vmem:[%s490_s1 + $0x28] sm:$0xff]  ;;  %v342_v4 = vld [vmem:[%s490_s1 + $0x20] sm:$0xff]  ;;  %168 = vmatpush.bf16.msra.mxu1 %v341_v0  ;;  %113 = vmatpush.bf16.msra.mxu0 %v337_v2  ;;  %vm423_vm4 = vmor %vm193_vm0, %vm194_vm1 }
   0x3   :  { %245 = vmatpush.bf16.msra.mxu2 %v343_v1  ;;  %v17_v5 = vld [vmem:[%s489_s0 + $0x4] sm:$0xf]  ;;  %v18_v6 = vld [vmem:[%s489_s0 + $0x8] sm:$0x1]  ;;  %v185_v7 = vld [vmem:[%s489_s0] sm:$0xe]  ;;  %344 = vmatpush.bf16.msra.mxu3 %v337_v2 }
   0x4   :  { %v320_v9 = vrot.slane %v185_v7, 9  ;;  %v198_v10 = vrot.slane %v17_v5, 5  ;;  %v201_v11 = vrot.slane %v18_v6, 5  ;;  %v336_v12 = vld [vmem:[%s490_s1 + $0x10] sm:$0xff]  ;;  %v16_v13 = vld [vmem:[%s489_s0] sm:$0xf]  ;;  %vm451_vm6 = vmor %vm22_vm3, %vm23_vm5 }
   0x5   :  { %v26_v14 = vshrl.u32 %v16_v13, 16  ;;  %v29_v15 = vshll.u32 %v16_v13, 16  ;;  %v35_v16 = vshll.u32 %v17_v5, 16  ;;  %v338_v17 = vld [vmem:[%s489_s0] sm:$0xff]  ;;  %v39_v20 = vshrl.u32 %v17_v5, 16 }
   0x6   :  { %v199_v18 = vsel %vm423_vm4, %v320_v9, %v198_v10  ;;  %v200_v19 = vrot.slane %v198_v10, 4  ;;  %v45_v21 = vshll.u32 %v18_v6, 16  ;;  %v19_v22 = vld [vmem:[%s489_s0 + $0xc] sm:$0xf]  ;;  %169 = vmatpush.bf16.msra.mxu1 %v340_v3  ;;  %v20_v27 = vld [vmem:[%s489_s0 + $0x10] sm:$0xf]  ;;  %114 = vmatpush.bf16.msra.mxu0 %v336_v12 }
   0x7   :  { %246 = vmatpush.bf16.msra.mxu2 %v342_v4  ;;  %v215_v23 = vunpack.c.l.b16 %v199_v18  ;;  %v28_v24 = vrot.slane %v26_v14, 4  ;;  %v31_v25 = vrot.slane %v29_v15, 5  ;;  %v37_v26 = vrot.slane %v35_v16, 5  ;;  %345 = vmatpush.bf16.msra.mxu3 %v336_v12  ;;  %v21_v31 = vld [vmem:[%s489_s0 + $0x14] sm:$0x1] }
   0x8   :  { %v202_v28 = vsel %vm423_vm4, %v200_v19, %v201_v11  ;;  %v41_v29 = vrot.slane %v39_v20, 4  ;;  %v47_v30 = vrot.slane %v45_v21, 5  ;;  %v50_v32 = vshrl.u32 %v19_v22, 16  ;;  %v186_v38 = vld [vmem:[%s489_s0 + $0xc] sm:$0xe] }
   0x9   :  { %v216_v33 = vunpack.c.l.b16 %v202_v28  ;;  %v32_v35 = vor.u32 %v31_v25, %v28_v24  ;;  %v53_v36 = vshll.u32 %v19_v22, 16  ;;  %v59_v37 = vshll.u32 %v20_v27, 16  ;;  %318 = vmatmul.msk.bf16.vlgmr.msra.gmra.mxu1 %vm100_vm2, %v338_v17 }
   0xa   :  { %v42_v39 = vor.u32 %v41_v29, %v37_v26  ;;  %v52_v40 = vrot.slane %v50_v32, 4  ;;  %v63_v41 = vshrl.u32 %v20_v27, 16  ;;  %v69_v42 = vshll.u32 %v21_v31, 16 }
   0xb   :  { %8 = vsyncpa [#allocation3], 0  ;;  %v219_v43 = vpack.c.b16 %v216_v33, %v215_v23  ;;  %v33_v44 = vrot.slane %v32_v35, 4  ;;  %v55_v45 = vrot.slane %v53_v36, 5  ;;  %v61_v46 = vrot.slane %v59_v37, 5  ;;  %v339_v9 = vld [vmem:[%s489_s0 + $0xc] sm:$0xff] }
   0xc   :  { %v43_v47 = vrot.slane %v42_v39, 4  ;;  %v65_v48 = vrot.slane %v63_v41, 4  ;;  %v71_v49 = vrot.slane %v69_v42, 5  ;;  %v321_v52 = vrot.slane %v186_v38, 9  ;;  %v349_v8 = vld [vmem:[%s491_s2] ss:$0 sm:$0xff] }
   0xd   :  { %334 = vmatmul.msk.bf16.vlgmr.msra.gmra.mxu2 %vm100_vm2, %v219_v43  ;;  %v38_v50 = vsel %vm451_vm6, %v33_v44, %v37_v26  ;;  %v56_v51 = vor.u32 %v55_v45, %v52_v40  ;;  %v205_v53 = vrot.slane %v20_v27, 5  ;;  %v208_v57 = vrot.slane %v21_v31, 5  ;;  %s376_s0 = smov [#allocation2]   ;;  %s276_s20 = sshll.u32 %s492_s3, 4  ;;  %s277_s20 = int_to_ptr.hbm [resolvable:$true] %s276_s20 }
   0xe   :  { %v48_v54 = vsel %vm451_vm6, %v43_v47, %v47_v30  ;;  %v82_v55 = vunpack.c.l.b16 %v38_v50  ;;  %v66_v56 = vor.u32 %v65_v48, %v61_v46  ;;  %s274_s2 = sshll.u32 %s376_s0, 4  ;;  %s377_s21 = smov 128   ;;  %s275_s2 = int_to_ptr.vmem [resolvable:$true] %s274_s2 }
   0xf   :  { %v83_v58 = vunpack.c.l.b16 %v48_v54  ;;  %v57_v59 = vrot.slane %v56_v51, 4  ;;  %v207_v60 = vrot.slane %v205_v53, 4  ;;  %v206_v2 = vsel %vm423_vm4, %v321_v52, %v205_v53  ;;  %s378_s22 = smov 8  }
  0x10   :  { %v67_v61 = vrot.slane %v66_v56, 4  ;;  %v217_v6 = vunpack.c.l.b16 %v206_v2 }
  0x11   :  { %v86_v62 = vpack.c.b16 %v83_v58, %v82_v55  ;;  %v62_v63 = vsel %vm451_vm6, %v57_v59, %v61_v46  ;;  %v209_v3 = vsel %vm423_vm4, %v207_v60, %v208_v57 }
  0x12   :  { %v72_v0 = vsel %vm451_vm6, %v67_v61, %v71_v49  ;;  %v84_v1 = vunpack.c.l.b16 %v62_v63  ;;  %v218_v7 = vunpack.c.l.b16 %v209_v3 }
  0x13   :  { %300 = vmatmul.msk.bf16.vlgmr.msra.gmra.mxu0 %vm100_vm2, %v86_v62  ;;  %v85_v4 = vunpack.c.l.b16 %v72_v0 }
  0x14   :  { %v220_v10 = vpack.c.b16 %v218_v7, %v217_v6 }
  0x15   :  { %v87_v5 = vpack.c.b16 %v85_v4, %v84_v1 }
  0x17   :  { %301 = vmatmul.msk.bf16.vlgmr.msra.gmra.mxu3 %vm100_vm2, %v87_v5 }
  0x19   :  { %319 = vmatmul.msk.bf16.gmra.mxu1 %vm100_vm2, %v339_v9 }
  0x1d   :  { %335 = vmatmul.msk.bf16.gmra.mxu2 %vm100_vm2, %v220_v10 }
  0x86   :  { %v171_v11 = vpop.f32.mrf.mxu1 }
  0x8e   :  { %v173_v12 = vpop.f32.mrf.mxu1 }
  0x90   :  { %v116_v13 = vpop.f32.mrf.mxu0  ;;  %v248_v14 = vpop.f32.mrf.mxu2 }
  0x91   :  { %v117_v15 = vadd.f32 %v349_v8, %v116_v13 }
  0x93   :  { %v181_v16 = vadd.f32 %v171_v11, %v117_v15 }
  0x95   :  { %v258_v17 = vadd.f32 %v248_v14, %v181_v16 }
  0x96   :  { %v176_v23 = vpop.f32.mrf.mxu1 }
  0x97   :  { %v262_v18 = vmax.f32 %v258_v17, 0.0 }
  0x98   :  { %v118_v19 = vpop.f32.mrf.mxu0  ;;  %v250_v20 = vpop.f32.mrf.mxu2 }
  0x99   :  { %266 = vst.msk [vmem:[#allocation2] sm:$0xff] %vm100_vm2, %v262_v18  ;;  %v119_v21 = vadd.f32 %v349_v8, %v118_v19 }
  0x9a   :  { %v121_v22 = vpop.f32.mrf.mxu3 }
  0x9b   :  { %v122_v24 = vadd.f32 %v349_v8, %v121_v22  ;;  %v182_v25 = vadd.f32 %v173_v12, %v119_v21 }
  0x9d   :  { %v259_v26 = vadd.f32 %v250_v20, %v182_v25  ;;  %v183_v27 = vadd.f32 %v176_v23, %v122_v24 }
  0x9e   :  { %v178_v33 = vpop.f32.mrf.mxu1 }
  0x9f   :  { %v263_v28 = vmax.f32 %v259_v26, 0.0 }
  0xa0   :  { %v253_v29 = vpop.f32.mrf.mxu2 }
  0xa1   :  { %267 = vst.msk [vmem:[#allocation2 + $0x8] sm:$0xff] %vm100_vm2, %v263_v28  ;;  %v260_v30 = vadd.f32 %v253_v29, %v183_v27 }
  0xa2   :  { %v123_v31 = vpop.f32.mrf.mxu3 }
  0xa3   :  { %v264_v32 = vmax.f32 %v260_v30, 0.0  ;;  %v124_v34 = vadd.f32 %v349_v8, %v123_v31 }
  0xa5   :  { %268 = vst.msk [vmem:[#allocation2 + $0x10] sm:$0xff] %vm100_vm2, %v264_v32  ;;  %v184_v35 = vadd.f32 %v178_v33, %v124_v34 }
  0xa8   :  { %v255_v36 = vpop.f32.mrf.mxu2 }
  0xa9   :  { %v261_v37 = vadd.f32 %v255_v36, %v184_v35 }
  0xab   :  { %v265_v38 = vmax.f32 %v261_v37, 0.0 }
  0xad   :  { %269 = vst.msk [vmem:[#allocation2 + $0x18] sm:$0xff] %vm100_vm2, %v265_v38 }
  0xae   :  { %282 = dma.vmem_to_hbm [thread:$0]  %s275_s2, 512, %s277_s20, [#allocation3], %s377_s21, %s377_s21, %s378_s22  }
  0xaf   :  { %374 = dma.done.wait [#allocation3], 512  }
  0xb0   :  { %375 = vsyncadd [#allocation3], 4294966784 }
  0xb1   :  { %287 = vsyncpa [#allocation3], 1 }

</bundles_post_ra>
